<compile_context>
chip_gen: v5e
topology: v5e:2x2
jax: 0.10.0
libtpu: 0.0.40
codegen_flags: <defaults>
</compile_context>

<pallas_src>
import functools
import math

import jax
import jax.numpy as jnp
from jax import lax
from jax.experimental import pallas as pl
from jax.experimental.pallas import tpu as pltpu


# ----------------------------------------------------------------------------
# Portable in-kernel PRNG: counter-based integer hash (lowbias32-style).
# Operates on uint32, wraps mod 2**32.  Only add/mul/xor/shift/compare, so it
# lowers on Mosaic and in interpret mode alike.
# ----------------------------------------------------------------------------
def _hash_bits_u32(x):
    x = x ^ (x >> 16)
    x = x * jnp.uint32(0x7FEB352D)
    x = x ^ (x >> 15)
    x = x * jnp.uint32(0x846CA68B)
    x = x ^ (x >> 16)
    return x


def _random_bits31(block_shape, pid_u32, rows_per_block, lanes, seed_u32):
    """31-bit nonneg int32 random bits, keyed by the GLOBAL flat element index
    (tiling-invariant) and the user seed."""
    r = lax.broadcasted_iota(jnp.int32, block_shape, 0).astype(jnp.uint32)
    c = lax.broadcasted_iota(jnp.int32, block_shape, 1).astype(jnp.uint32)
    flat = (pid_u32 * jnp.uint32(rows_per_block) + r) * jnp.uint32(lanes) + c
    bits = _hash_bits_u32(flat + seed_u32 * jnp.uint32(0x9E3779B9))
    return (bits >> 1).astype(jnp.int32)            # in [0, 2**31)


def _shift_right_zero(v, s):
    """y[:, j] = v[:, j - s] for j >= s, else 0 (static shift along the lane axis)."""
    if s <= 0:
        return v
    nc, hw = v.shape
    if s >= hw:
        return jnp.zeros_like(v)
    pad = jnp.zeros((nc, s), dtype=v.dtype)
    return jnp.concatenate([pad, v[:, : hw - s]], axis=1)


# ----------------------------------------------------------------------------
# Kernel 1: standard dropout  (F.dropout(x, p, training=True))
# keep element with prob 1-p, scale kept elements by 1/(1-p).
# ----------------------------------------------------------------------------
def _dropout_kernel(seed_ref, thresh_ref, scale_ref, x_ref, o_ref):
    rows, lanes = x_ref.shape
    pid_u = pl.program_id(0).astype(jnp.uint32)
    seed_u = seed_ref[0].astype(jnp.uint32)
    bits31 = _random_bits31((rows, lanes), pid_u, rows, lanes, seed_u)
    keep = bits31 >= thresh_ref[0]                       # drop with prob ~= p
    o_ref[...] = jnp.where(keep, x_ref[...] * scale_ref[0], 0.0).astype(o_ref.dtype)


def pallas_dropout(x, p, seed):
    p = float(p)
    if p <= 0.0:
        return x
    if p >= 1.0:                                         # F.dropout(p=1) -> zeros
        return jnp.zeros_like(x)

    orig_shape, dtype = x.shape, x.dtype
    total = math.prod(orig_shape)

    LANE = 512            # lane-dense last dim (multiple of 128 -> unmasked vst)
    ROW_BLOCK = 1024      # 1024 x 512 f32 = 2 MiB per block buffer (v7x-safe)
    chunk = LANE * ROW_BLOCK
    if total <= chunk:
        padded = -(-total // LANE) * LANE
        rows = padded // LANE
        row_blk = rows                                   # single block == full dims
    else:
        padded = -(-total // chunk) * chunk
        rows = padded // LANE
        row_blk = ROW_BLOCK
    grid = rows // row_blk

    xf = jnp.ravel(x)
    if padded != total:
        xf = jnp.pad(xf, (0, padded - total))
    xf = xf.reshape(rows, LANE)

    seed_arr = jnp.array([int(seed)], dtype=jnp.int32)
    thresh = max(0, min(int(round(p * float(1 << 31))), (1 << 31) - 1))
    thresh_arr = jnp.array([thresh], dtype=jnp.int32)
    scale_arr = jnp.array([1.0 / (1.0 - p)], dtype=jnp.float32)

    out = pl.pallas_call(
        _dropout_kernel,
        out_shape=jax.ShapeDtypeStruct((rows, LANE), dtype),
        grid=(grid,),
        in_specs=[
            pl.BlockSpec(memory_space=pltpu.MemorySpace.SMEM),   # seed
            pl.BlockSpec(memory_space=pltpu.MemorySpace.SMEM),   # integer drop threshold
            pl.BlockSpec(memory_space=pltpu.MemorySpace.SMEM),   # 1/(1-p)
            pl.BlockSpec((row_blk, LANE), lambda i: (i, 0)),     # x tiles
        ],
        out_specs=pl.BlockSpec((row_blk, LANE), lambda i: (i, 0)),
        compiler_params=pltpu.CompilerParams(
            dimension_semantics=("parallel",),
            vmem_limit_bytes=32 * 1024 * 1024,
        ),
    )(seed_arr, thresh_arr, scale_arr, xf)

    return out.reshape(-1)[:total].reshape(orig_shape)


# ----------------------------------------------------------------------------
# Kernel 2: DropBlock
#   mask       ~ Bernoulli(gamma) on (N*C, H*W)
#   block_mask = separable max-dilation of mask by a (bs x bs) block clipped at
#                the H/W borders (identical to the index-offset construction in
#                the PyTorch reference)
#   kernel out = (1 - block_mask) * x   and   per-block sum(1 - block_mask)
#   wrapper    = out * (N*C*H*W / global_count)   (exact global renormalization)
# ----------------------------------------------------------------------------
def _dropblock_kernel(seed_ref, thresh_ref, wcol_ref, x_ref, masked_ref, cnt_ref,
                      *, width, block_size):
    nc, hw = x_ref.shape
    pid_u = pl.program_id(0).astype(jnp.uint32)
    seed_u = seed_ref[0].astype(jnp.uint32)

    bits31 = _random_bits31((nc, hw), pid_u, nc, hw, seed_u)
    mask = (bits31 < thresh_ref[0]).astype(jnp.float32)      # 1 = block seed (prob gamma)

    # ---- separable (bs x bs) max-dilation anchored at the seed ----
    # W pass: shift along the lane axis; a shift of dw must not leak across image
    # rows, so gate with the precomputed column index (j % W) -- a (1, HW) mask.
    wcol = wcol_ref[...]
    dil_w = mask
    for dw in range(1, block_size):
        sh = _shift_right_zero(mask, dw)
        dil_w = jnp.maximum(dil_w, jnp.where(wcol >= dw, sh, 0.0))
    # H pass: a shift of dh rows == dh*W flat lanes; the zero-fill shift already
    # implements the i-dh >= 0 clipping, so no extra validity mask is needed.
    blk = dil_w
    for dh in range(1, block_size):
        blk = jnp.maximum(blk, _shift_right_zero(dil_w, dh * width))

    inv = 1.0 - blk
    masked_ref[...] = (inv * x_ref[...]).astype(masked_ref.dtype)

    part = jnp.sum(inv, axis=1, keepdims=True)               # (nc, 1)
    cnt_ref[...] = jnp.sum(part, axis=0, keepdims=True).reshape(1, 1, 1)


def _pick_nc_tile(nc, cap_rows):
    """Largest legal (multiple-of-8, divides NC) plane-tile under the VMEM cap."""
    if nc <= cap_rows:
        return nc
    cap8 = (min(cap_rows, nc) // 8) * 8
    for d in range(cap8, 0, -8):
        if nc % d == 0:
            return d
    # TODO(synk): NC has no multiple-of-8 divisor under the VMEM cap; fall back to
    # one big block rather than an illegal sub-8 sublane tile.
    return nc


def pallas_dropblock(x, gamma, block_size, seed):
    N, C, H, W = x.shape
    NC, HW = N * C, H * W
    dtype = x.dtype
    block_size = int(block_size)

    xf = x.reshape(NC, HW)
    # ~1 MiB of x per grid step keeps x + mask/dilation temporaries + double
    # buffering comfortably inside v7x's 64 MiB VMEM; v6e/v5e have headroom to spare.
    cap_rows = max(1, (1 << 20) // (HW * dtype.itemsize))
    nc_tile = _pick_nc_tile(NC, cap_rows)
    grid = NC // nc_tile

    wcol = (jnp.arange(HW, dtype=jnp.int32) % W).reshape(1, HW)   # j % W, hoisted
    seed_arr = jnp.array([int(seed)], dtype=jnp.int32)
    thresh = max(0, min(int(round(float(gamma) * float(1 << 31))), (1 << 31) - 1))
    thresh_arr = jnp.array([thresh], dtype=jnp.int32)

    kernel = functools.partial(_dropblock_kernel, width=W, block_size=block_size)
    masked, counts = pl.pallas_call(
        kernel,
        out_shape=(
            jax.ShapeDtypeStruct((NC, HW), dtype),               # inv_mask * x
            jax.ShapeDtypeStruct((grid, 1, 1), jnp.float32),     # per-block count
        ),
        grid=(grid,),
        in_specs=[
            pl.BlockSpec(memory_space=pltpu.MemorySpace.SMEM),   # seed
            pl.BlockSpec(memory_space=pltpu.MemorySpace.SMEM),   # gamma threshold
            pl.BlockSpec((1, HW), lambda i: (0, 0)),             # column index j % W
            pl.BlockSpec((nc_tile, HW), lambda i: (i, 0)),       # x planes
        ],
        out_specs=(
            pl.BlockSpec((nc_tile, HW), lambda i: (i, 0)),
            pl.BlockSpec((1, 1, 1), lambda i: (i, 0, 0)),
        ),
        compiler_params=pltpu.CompilerParams(
            dimension_semantics=("parallel",),
            vmem_limit_bytes=32 * 1024 * 1024,
        ),
    )(seed_arr, thresh_arr, wcol, xf)

    # Exact reference semantics: global countM / count_ones over the WHOLE tensor.
    count_m = float(N * C * H * W)
    count_ones = jnp.maximum(jnp.sum(counts), 1.0)               # guard all-dropped
    y = masked.astype(jnp.float32) * (count_m / count_ones)
    return y.reshape(N, C, H, W).astype(dtype)


# ----------------------------------------------------------------------------
# Python wrapper mirroring DropoutAUG.forward semantics
# ----------------------------------------------------------------------------
class DropoutAUG:
    def __init__(self, p=0.5, inplace=False, drop_block=False, drop_size=1,
                 drop_stablization=1):
        assert drop_size > 0
        assert drop_stablization > 0
        self.drop_rate = p
        self.drop_inplace = bool(inplace)   # no-op in a functional JAX setting
        self.drop_size = drop_size
        self.drop_stablization = drop_stablization
        self.drop_block = bool(drop_block)
        self.num_batches_tracked = 0
        self.training = True

    def __call__(self, x, seed=0):
        if self.drop_rate > 0:
            self.num_batches_tracked += 1
            if self.drop_block and self.drop_size > 1:
                N, C, H, W = x.shape
                keep_rate = max(
                    1.0 - self.drop_rate / float(self.drop_stablization)
                    * self.num_batches_tracked,
                    1.0 - self.drop_rate,
                )
                gamma = ((1.0 - keep_rate) / float(self.drop_size ** 2)
                         * float(H) * float(W)
                         / float(H - self.drop_size + 1)
                         / float(W - self.drop_size + 1))
                if self.training:
                    return pallas_dropblock(x, gamma, self.drop_size, seed)
                return x
            else:
                if self.training:
                    return pallas_dropout(x, self.drop_rate, seed)
                return x
        return x


# ----------------------------------------------------------------------------
# Demo / smoke test
# ----------------------------------------------------------------------------
if __name__ == "__main__":
    key = jax.random.PRNGKey(0)
    x = jax.random.normal(key, (2, 4, 16, 16), dtype=jnp.float32)

    # Branch 1: plain dropout (module defaults: p=0.5, drop_block=False)
    aug_dropout = DropoutAUG(p=0.5)
    y1 = jax.block_until_ready(aug_dropout(x, seed=123))
    assert y1.shape == x.shape and y1.dtype == x.dtype
    assert bool(jnp.all(jnp.isfinite(y1)))
    kept = jnp.abs(y1) > 0
    assert bool(jnp.allclose(jnp.where(kept, y1, 0.0),
                             jnp.where(kept, x * 2.0, 0.0), atol=1e-5))

    # Branch 2: DropBlock (drop_block=True, drop_size>1)
    aug_dropblock = DropoutAUG(p=0.5, drop_block=True, drop_size=3,
                               drop_stablization=5)
    y2 = jax.block_until_ready(aug_dropblock(x, seed=456))
    assert y2.shape == x.shape and y2.dtype == x.dtype
    assert bool(jnp.all(jnp.isfinite(y2)))

    # Eval mode passes through unchanged.
    aug_dropout.training = False
    assert bool(jnp.allclose(aug_dropout(x), x))

    print("KERNEL_OK")
</pallas_src>

<mosaic_0001>
module attributes {stable_mosaic.version = 11 : i64} {
  func.func @_dropout_kernel(%arg0: i32, %arg1: memref<1xi32, #tpu.memory_space<smem>>, %arg2: memref<1xi32, #tpu.memory_space<smem>>, %arg3: memref<1xf32, #tpu.memory_space<smem>>, %arg4: memref<4x512xf32, #tpu.memory_space<vmem>>, %arg5: memref<4x512xf32, #tpu.memory_space<vmem>>) attributes {dimension_semantics = [#tpu.dimension_semantics<parallel>], iteration_bounds = array<i64: 1>, scalar_prefetch = 0 : i64, scratch_operands = 0 : i64, tpu.core_type = #tpu.core_type<tc>, window_params = [{transform_indices = @transform_0, window_bounds = array<i64: 1>}, {transform_indices = @transform_1, window_bounds = array<i64: 1>}, {transform_indices = @transform_2, window_bounds = array<i64: 1>}, {transform_indices = @transform_3, window_bounds = array<i64: 4, 512>}, {transform_indices = @transform_4, window_bounds = array<i64: 4, 512>}]} {
    %c0 = arith.constant 0 : index
    %0 = memref.load %arg1[%c0] : memref<1xi32, #tpu.memory_space<smem>>
    %1 = tpu.iota {dimensions = array<i32: 0>} : vector<4x512xi32>
    %2 = tpu.iota {dimensions = array<i32: 1>} : vector<4x512xi32>
    %c4_i32 = arith.constant 4 : i32
    %3 = arith.muli %arg0, %c4_i32 : i32
    %4 = vector.broadcast %3 : i32 to vector<4x512xi32>
    %5 = arith.addi %4, %1 : vector<4x512xi32>
    %c512_i32 = arith.constant 512 : i32
    %6 = vector.broadcast %c512_i32 : i32 to vector<4x512xi32>
    %7 = arith.muli %5, %6 : vector<4x512xi32>
    %8 = arith.addi %7, %2 : vector<4x512xi32>
    %c-1640531527_i32 = arith.constant -1640531527 : i32
    %9 = arith.muli %0, %c-1640531527_i32 : i32
    %10 = vector.broadcast %9 : i32 to vector<4x512xi32>
    %11 = arith.addi %8, %10 : vector<4x512xi32>
    %c16_i32 = arith.constant 16 : i32
    %12 = vector.broadcast %c16_i32 : i32 to vector<4x512xi32>
    %13 = arith.shrui %11, %12 : vector<4x512xi32>
    %14 = arith.xori %11, %13 : vector<4x512xi32>
    %c2146121005_i32 = arith.constant 2146121005 : i32
    %15 = vector.broadcast %c2146121005_i32 : i32 to vector<4x512xi32>
    %16 = arith.muli %14, %15 : vector<4x512xi32>
    %c15_i32 = arith.constant 15 : i32
    %17 = vector.broadcast %c15_i32 : i32 to vector<4x512xi32>
    %18 = arith.shrui %16, %17 : vector<4x512xi32>
    %19 = arith.xori %16, %18 : vector<4x512xi32>
    %c-2073254261_i32 = arith.constant -2073254261 : i32
    %20 = vector.broadcast %c-2073254261_i32 : i32 to vector<4x512xi32>
    %21 = arith.muli %19, %20 : vector<4x512xi32>
    %c16_i32_0 = arith.constant 16 : i32
    %22 = vector.broadcast %c16_i32_0 : i32 to vector<4x512xi32>
    %23 = arith.shrui %21, %22 : vector<4x512xi32>
    %24 = arith.xori %21, %23 : vector<4x512xi32>
    %c1_i32 = arith.constant 1 : i32
    %25 = vector.broadcast %c1_i32 : i32 to vector<4x512xi32>
    %26 = arith.shrui %24, %25 : vector<4x512xi32>
    %c0_1 = arith.constant 0 : index
    %27 = memref.load %arg2[%c0_1] : memref<1xi32, #tpu.memory_space<smem>>
    %28 = vector.broadcast %27 : i32 to vector<4x512xi32>
    %29 = arith.cmpi sge, %26, %28 : vector<4x512xi32>
    %c0_2 = arith.constant 0 : index
    %c0_3 = arith.constant 0 : index
    %30 = vector.load %arg4[%c0_2, %c0_3] : memref<4x512xf32, #tpu.memory_space<vmem>>, vector<4x512xf32>
    %c0_4 = arith.constant 0 : index
    %31 = memref.load %arg3[%c0_4] : memref<1xf32, #tpu.memory_space<smem>>
    %32 = vector.broadcast %31 : f32 to vector<4x512xf32>
    %33 = arith.mulf %30, %32 : vector<4x512xf32>
    %cst = arith.constant 0.000000e+00 : f32
    %34 = vector.broadcast %cst : f32 to vector<4x512xf32>
    %35 = arith.select %29, %33, %34 : vector<4x512xi1>, vector<4x512xf32>
    %c0_5 = arith.constant 0 : index
    %c0_6 = arith.constant 0 : index
    %36 = vector.load %arg5[%c0_5, %c0_6] : memref<4x512xf32, #tpu.memory_space<vmem>>, vector<4x512xf32>
    tpu.vector_store %arg5[%c0_5, %c0_6], %35 {strides = array<i32>} : memref<4x512xf32, #tpu.memory_space<vmem>>, vector<4x512xf32>,
    return
  }
  func.func @transform_0(%arg0: i32) -> i32 {
    %c0_i32 = arith.constant 0 : i32
    %c0_i32_0 = arith.constant 0 : i32
    return %c0_i32 : i32
  }
  func.func @transform_1(%arg0: i32) -> i32 {
    %c0_i32 = arith.constant 0 : i32
    %c0_i32_0 = arith.constant 0 : i32
    return %c0_i32 : i32
  }
  func.func @transform_2(%arg0: i32) -> i32 {
    %c0_i32 = arith.constant 0 : i32
    %c0_i32_0 = arith.constant 0 : i32
    return %c0_i32 : i32
  }
  func.func @transform_3(%arg0: i32) -> (i32, i32) {
    %c0_i32 = arith.constant 0 : i32
    %c0_i32_0 = arith.constant 0 : i32
    return %arg0, %c0_i32 : i32, i32
  }
  func.func @transform_4(%arg0: i32) -> (i32, i32) {
    %c0_i32 = arith.constant 0 : i32
    %c0_i32_0 = arith.constant 0 : i32
    return %arg0, %c0_i32 : i32, i32
  }
}

</mosaic_0001>

<bundles_post_ra>
// kernel: tpu_custom_call.1
= control target key start
LH: loop header
LB: loop body
LE: loop exit
PB: predicated region body
PF: predicated region fallthrough
CT: control target
= control target key end

     0   :  { %12 = vsyncpa [#allocation6], 0  ;;  %s256_s0 = inlined_call_operand.<no memory space> [shape: s32[1], index: 0, kind: input, shape index: {}]   ;;  %s257_s1 = inlined_call_operand.<no memory space> [shape: s32[1], index: 1, kind: input, shape index: {}]   ;;  %s258_s2 = inlined_call_operand.<no memory space> [shape: f32[1], index: 2, kind: input, shape index: {}]   ;;  %s259_s3 = inlined_call_operand.hbm [shape: f32[4,512], index: 3, kind: input, shape index: {}]   ;;  %s260_s4 = inlined_call_operand.hbm [shape: f32[4,512], index: 4, kind: output, shape index: {}]  }
   0x1   :  { %13 = vsyncpa [#allocation7], 0  ;;  %s25_s17 = sshll.u32 %s259_s3, 4  ;;  %s206_s18 = smov [#allocation5]   ;;  %s26_s17 = int_to_ptr.hbm [resolvable:$true] %s25_s17 }
   0x2   :  { %s27_s19 = sshll.u32 %s206_s18, 4  ;;  %s28_s19 = int_to_ptr.vmem [resolvable:$true] %s27_s19 }
   0x3   :  { %30 = dma.hbm_to_vmem [thread:$0]  %s26_s17, 256, %s28_s19, [#allocation6]  }
   0x4   :  { %202 = dma.done.wait [#allocation6], 256  }
   0x5   :  { %203 = vsyncadd [#allocation6], 4294967040  ;;  %v36_v0 = vlaneseq  ;;  %s51_s22 = smul.u32 2654435769, %s256_s0  ;;  %v102_v7 = vstv %s258_s2  ;;  %v99_v13 = vld [vmem:[#allocation5] sm:$0xff]  ;;  %v100_v14 = vld [vmem:[#allocation5 + $0x8] sm:$0xff]  ;;  %v94_v51 = vstv %s257_s1 }
   0x6   :  { %v103_v15 = vmul.f32 %v102_v7, %v99_v13  ;;  %v104_v16 = vmul.f32 %v102_v7, %v100_v14  ;;  %vm128_vm2 = vcmask 1043456   ;;  %s207_s1 = smov [#allocation8]   ;;  %s142_s27 = sshll.u32 %s260_s4, 4  ;;  %s143_s27 = int_to_ptr.hbm [resolvable:$true] %s142_s27 }
   0x7   :  { %v37_v1 = vshrl.u32 %v36_v0, 7  ;;  %v39_v2 = vand.u32 127, %v36_v0  ;;  %v52_v8 = vstv %s51_s22  ;;  %s140_s24 = sshll.u32 %s207_s1, 4  ;;  %s141_s24 = int_to_ptr.vmem [resolvable:$true] %s140_s24 }
   0x8   :  { %107 = vst [vmem:[#allocation1] ss:$2 sm:$0xff] %v103_v15 }
   0x9   :  { %v40_v3 = vadd.s32 128, %v39_v2  ;;  %v46_v4 = vmul.u32 512, %v37_v1  ;;  %v41_v5 = vadd.s32 256, %v39_v2  ;;  %v42_v6 = vadd.s32 384, %v39_v2  ;;  %109 = vst [vmem:[#allocation1 + $0x10] ss:$2 sm:$0xff] %v104_v16 }
   0xb   :  { %v47_v9 = vadd.s32 %v46_v4, %v39_v2  ;;  %v48_v10 = vadd.s32 %v46_v4, %v40_v3  ;;  %v49_v11 = vadd.s32 %v46_v4, %v41_v5  ;;  %v50_v12 = vadd.s32 %v46_v4, %v42_v6 }
   0xd   :  { %v53_v17 = vadd.s32 %v52_v8, %v47_v9  ;;  %v54_v18 = vadd.s32 %v52_v8, %v48_v10  ;;  %v55_v19 = vadd.s32 %v52_v8, %v49_v11  ;;  %v56_v20 = vadd.s32 %v52_v8, %v50_v12 }
   0xf   :  { %v57_v21 = vshrl.u32 %v53_v17, 16  ;;  %v58_v22 = vshrl.u32 %v54_v18, 16  ;;  %v59_v23 = vshrl.u32 %v55_v19, 16  ;;  %v60_v24 = vshrl.u32 %v56_v20, 16 }
  0x10   :  { %v111_v54 = vld.sshfl [vmem:[#allocation1 + $0x8] sm:$0xff pattern:$0x75316420]  ;;  %v110_v57 = vld.sshfl [vmem:[#allocation1] sm:$0xff pattern:$0x75316420] }
  0x11   :  { %v61_v25 = vxor.u32 %v57_v21, %v53_v17  ;;  %v62_v26 = vxor.u32 %v58_v22, %v54_v18  ;;  %v63_v27 = vxor.u32 %v59_v23, %v55_v19  ;;  %v64_v28 = vxor.u32 %v60_v24, %v56_v20  ;;  %v113_v61 = vld.sshfl [vmem:[#allocation1 + $0x18] sm:$0xff pattern:$0x75316420]  ;;  %v112_v0 = vld.sshfl [vmem:[#allocation1 + $0x10] sm:$0xff pattern:$0x75316420] }
  0x13   :  { %v65_v29 = vmul.u32 2146121005, %v61_v25  ;;  %v66_v30 = vmul.u32 2146121005, %v62_v26  ;;  %v67_v31 = vmul.u32 2146121005, %v63_v27 }
  0x14   :  { %v68_v32 = vmul.u32 2146121005, %v64_v28 }
  0x15   :  { %v69_v33 = vshrl.u32 %v65_v29, 15  ;;  %v70_v34 = vshrl.u32 %v66_v30, 15  ;;  %v71_v37 = vshrl.u32 %v67_v31, 15 }
  0x16   :  { %v72_v38 = vshrl.u32 %v68_v32, 15 }
  0x17   :  { %v73_v35 = vxor.u32 %v69_v33, %v65_v29  ;;  %v74_v36 = vxor.u32 %v70_v34, %v66_v30  ;;  %v75_v41 = vxor.u32 %v71_v37, %v67_v31 }
  0x18   :  { %v76_v42 = vxor.u32 %v72_v38, %v68_v32 }
  0x19   :  { %v77_v39 = vmul.u32 2221713035, %v73_v35  ;;  %v78_v40 = vmul.u32 2221713035, %v74_v36  ;;  %v79_v45 = vmul.u32 2221713035, %v75_v41 }
  0x1a   :  { %v80_v46 = vmul.u32 2221713035, %v76_v42 }
  0x1b   :  { %v81_v43 = vshrl.u32 %v77_v39, 16  ;;  %v82_v44 = vshrl.u32 %v78_v40, 16  ;;  %v83_v49 = vshrl.u32 %v79_v45, 16 }
  0x1c   :  { %v84_v50 = vshrl.u32 %v80_v46, 16 }
  0x1d   :  { %v85_v47 = vxor.u32 %v81_v43, %v77_v39  ;;  %v86_v48 = vxor.u32 %v82_v44, %v78_v40  ;;  %v87_v55 = vxor.u32 %v83_v49, %v79_v45 }
  0x1e   :  { %v88_v56 = vxor.u32 %v84_v50, %v80_v46 }
  0x1f   :  { %v89_v52 = vshrl.u32 %v85_v47, 1  ;;  %v90_v53 = vshrl.u32 %v86_v48, 1  ;;  %v91_v59 = vshrl.u32 %v87_v55, 1 }
  0x20   :  { %v92_v60 = vshrl.u32 %v88_v56, 1 }
  0x21   :  { %vm245_vm0 = vcmp.ge.s32.totalorder %v89_v52, %v94_v51  ;;  %vm96_vm1 = vcmp.ge.s32.totalorder %v90_v53, %v94_v51  ;;  %vm97_vm3 = vcmp.ge.s32.totalorder %v91_v59, %v94_v51 }
  0x22   :  { %v119_v62 = vsel %vm96_vm1, %v111_v54, 0.0  ;;  %vm98_vm4 = vcmp.ge.s32.totalorder %v92_v60, %v94_v51  ;;  %v118_v1 = vsel %vm245_vm0, %v110_v57, 0.0  ;;  %v120_v5 = vsel %vm97_vm3, %v112_v0, 0.0 }
  0x23   :  { %v126_v63 = vrot.slane %v119_v62, 4  ;;  %v121_v2 = vsel %vm98_vm4, %v113_v61, 0.0 }
  0x24   :  { %v127_v4 = vrot.slane %v121_v2, 4 }
  0x25   :  { %v129_v3 = vsel %vm128_vm2, %v118_v1, %v126_v63 }
  0x26   :  { %133 = vst [vmem:[#allocation8] sm:$0xff] %v129_v3  ;;  %v130_v6 = vsel %vm128_vm2, %v120_v5, %v127_v4 }
  0x27   :  { %134 = vst [vmem:[#allocation8 + $0x8] sm:$0xff] %v130_v6 }
  0x28   :  { %145 = dma.vmem_to_hbm [thread:$0]  %s141_s24, 256, %s143_s27, [#allocation7]  }
  0x29   :  { %204 = dma.done.wait [#allocation7], 256  }
  0x2a   :  { %205 = vsyncadd [#allocation7], 4294967040 }
  0x2b   :  { %150 = vsyncpa [#allocation6], 1 }
  0x2c   :  { %151 = vsyncpa [#allocation7], 1 }

</bundles_post_ra>
